<compile_context>
chip_gen: v6e
topology: v6e:2x2x1
jax: 0.10.0
libtpu: 0.0.40
codegen_flags: <defaults>
</compile_context>

<pallas_src>
import jax
import jax.numpy as jnp
from jax.experimental import pallas as pl
from jax.experimental.pallas import tpu as pltpu


def _round_up(n, m):
    return ((n + m - 1) // m) * m


def _birank_kernel(x_ref, w1t_ref, b1_ref, w2_ref, b2_ref, o_ref):
    # x_ref:  [D, TB]  f32   (batch on the lane axis -> fully lane-dense)
    # w1t_ref:[H, D]   bf16  (first-layer weights, transposed: h = w1t @ x)
    # b1_ref: [H, 1]   f32
    # w2_ref: [H, 1]   f32   (second-layer weights as a column)
    # b2_ref: [1, 1]   f32   (SMEM scalar)
    # o_ref:  [1, TB]  f32   (lane-dense output row)
    x = x_ref[...].astype(jnp.bfloat16)                                  # in-kernel cast (VPU)
    h = jnp.dot(w1t_ref[...], x, preferred_element_type=jnp.float32)    # [H, TB] f32 (MXU)
    h = jnp.maximum(h + b1_ref[...], 0.0)                                # bias + ReLU in f32
    # Layer 2: VPU broadcast-multiply + sublane reduce; h stays f32, no relayout.
    y = jnp.sum(h * w2_ref[...], axis=0, keepdims=True)                  # [1, TB] f32
    o_ref[...] = y + b2_ref[0, 0]


def birank_forward(x, w1, b1, w2, b2, *, max_tile=32768):
    """x: [B, D] f32; w1: [D, H]; b1: [1, H]; w2: [H, 1]; b2: [1, 1] -> [B, 1] f32."""
    B, D = x.shape
    H = w1.shape[1]

    # ~2 tiles for large B (keeps both v7x TCs busy, amortizes per-step overhead),
    # capped for VMEM; always a multiple of 128 lanes.
    TB = max(128, min(max_tile, _round_up(pl.cdiv(B, 2), 128)))
    B_pad = _round_up(B, TB)
    num_tiles = B_pad // TB

    # Single wrapper pad+transpose; x stays f32 (bf16 cast happens in-kernel).
    x_t = jnp.pad(x, ((0, B_pad - B), (0, 0))).T                # [D, B_pad] f32
    w1t = w1.T.astype(jnp.bfloat16)                              # [H, D] bf16
    b1_c = b1.reshape(H, 1).astype(jnp.float32)                  # [H, 1]
    w2_c = w2.reshape(H, 1).astype(jnp.float32)                  # [H, 1]
    b2_s = b2.reshape(1, 1).astype(jnp.float32)                  # [1, 1] (SMEM)

    cost = pl.CostEstimate(
        flops=int(2 * B_pad * H * (D + 1)),
        transcendentals=0,
        bytes_accessed=int(B_pad * D * 4 + B_pad * 4 + H * D * 2 + (2 * H + 1) * 4),
    )

    out = pl.pallas_call(
        _birank_kernel,
        out_shape=jax.ShapeDtypeStruct((1, B_pad), jnp.float32),
        grid=(num_tiles,),
        in_specs=[
            pl.BlockSpec((D, TB), lambda i: (0, i)),                # x tile (pipelined, lane-dense)
            pl.BlockSpec((H, D), lambda i: (0, 0)),                 # w1^T (resident)
            pl.BlockSpec((H, 1), lambda i: (0, 0)),                 # b1   (resident)
            pl.BlockSpec((H, 1), lambda i: (0, 0)),                 # w2   (resident)
            pl.BlockSpec(memory_space=pltpu.MemorySpace.SMEM),      # b2 scalar
        ],
        out_specs=pl.BlockSpec((1, TB), lambda i: (0, i)),          # lane-dense output row
        compiler_params=pltpu.CompilerParams(
            dimension_semantics=("parallel",),
        ),
        cost_estimate=cost,
    )(x_t, w1t, b1_c, w2_c, b2_s)

    return out[0, :B].reshape(B, 1)


def init_params(key, input_dim=12, hidden=32):
    # Deterministic init mimicking PyTorch nn.Linear defaults
    # (uniform in +-1/sqrt(fan_in)); synthetic weights, no checkpoint load.
    k1, k2, k3, k4 = jax.random.split(key, 4)
    bound1 = 1.0 / jnp.sqrt(jnp.float32(input_dim))
    bound2 = 1.0 / jnp.sqrt(jnp.float32(hidden))
    w1 = jax.random.uniform(k1, (input_dim, hidden), jnp.float32, -bound1, bound1)
    b1 = jax.random.uniform(k2, (1, hidden), jnp.float32, -bound1, bound1)
    w2 = jax.random.uniform(k3, (hidden, 1), jnp.float32, -bound2, bound2)
    b2 = jax.random.uniform(k4, (1, 1), jnp.float32, -bound2, bound2)
    return w1, b1, w2, b2


def _reference_bf16(x, w1, b1, w2, b2):
    # Emulates the kernel's precision path: bf16 x / w1, f32 accumulation,
    # layer 2 entirely in f32 (no bf16 recast of h).
    xb = x.astype(jnp.bfloat16).astype(jnp.float32)
    w1b = w1.astype(jnp.bfloat16).astype(jnp.float32)
    h = jnp.maximum(xb @ w1b + b1, 0.0)
    return h @ w2 + b2


if __name__ == "__main__":
    key = jax.random.PRNGKey(0)
    kx, kx2, kp = jax.random.split(key, 3)

    batch, input_dim, hidden = 8, 12, 32
    w1, b1, w2, b2 = init_params(kp, input_dim=input_dim, hidden=hidden)

    # Small demo batch (single 128-lane tile after padding).
    x = jax.random.normal(kx, (batch, input_dim), jnp.float32)
    out = birank_forward(x, w1, b1, w2, b2)
    jax.block_until_ready(out)
    assert out.shape == (batch, 1)
    ref = _reference_bf16(x, w1, b1, w2, b2)
    assert jnp.allclose(out, ref, atol=1e-3, rtol=1e-3)
    # Loose check vs the pure-f32 semantics of the original module.
    ref_f32 = jnp.maximum(x @ w1 + b1, 0.0) @ w2 + b2
    assert jnp.allclose(out, ref_f32, atol=3e-2, rtol=3e-2)

    # Exercise multi-tile grid + padding (batch not a multiple of the tile).
    batch2 = 300
    x2 = jax.random.normal(kx2, (batch2, input_dim), jnp.float32)
    out2 = birank_forward(x2, w1, b1, w2, b2)   # -> TB=256, 2 grid steps
    jax.block_until_ready(out2)
    assert out2.shape == (batch2, 1)
    ref2 = _reference_bf16(x2, w1, b1, w2, b2)
    assert jnp.allclose(out2, ref2, atol=1e-3, rtol=1e-3)

    print("KERNEL_OK")
</pallas_src>

<mosaic_0001>
module attributes {stable_mosaic.version = 11 : i64} {
  func.func @_birank_kernel(%arg0: i32, %arg1: memref<12x128xf32, #tpu.memory_space<vmem>>, %arg2: memref<32x12xbf16, #tpu.memory_space<vmem>>, %arg3: memref<32x1xf32, #tpu.memory_space<vmem>>, %arg4: memref<32x1xf32, #tpu.memory_space<vmem>>, %arg5: memref<1x1xf32, #tpu.memory_space<smem>>, %arg6: memref<1x128xf32, #tpu.memory_space<vmem>>) attributes {dimension_semantics = [#tpu.dimension_semantics<parallel>], iteration_bounds = array<i64: 1>, scalar_prefetch = 0 : i64, scratch_operands = 0 : i64, tpu.core_type = #tpu.core_type<tc>, window_params = [{transform_indices = @transform_0, window_bounds = array<i64: 12, 128>}, {pipeline_mode = #tpu.pipeline_mode<synchronous>, transform_indices = @transform_1, window_bounds = array<i64: 32, 12>}, {pipeline_mode = #tpu.pipeline_mode<synchronous>, transform_indices = @transform_2, window_bounds = array<i64: 32, 1>}, {pipeline_mode = #tpu.pipeline_mode<synchronous>, transform_indices = @transform_3, window_bounds = array<i64: 32, 1>}, {transform_indices = @transform_4, window_bounds = array<i64: 1, 1>}, {transform_indices = @transform_5, window_bounds = array<i64: 1, 128>}]} {
    %c0 = arith.constant 0 : index
    %c0_0 = arith.constant 0 : index
    %0 = vector.load %arg1[%c0, %c0_0] : memref<12x128xf32, #tpu.memory_space<vmem>>, vector<12x128xf32>
    %1 = arith.truncf %0 : vector<12x128xf32> to vector<12x128xbf16>
    %c0_1 = arith.constant 0 : index
    %c0_2 = arith.constant 0 : index
    %2 = vector.load %arg2[%c0_1, %c0_2] : memref<32x12xbf16, #tpu.memory_space<vmem>>, vector<32x12xbf16>
    %cst = arith.constant dense<0.000000e+00> : vector<32x128xf32>
    %3 = tpu.matmul %2, %1, %cst {dimension_numbers = #tpu.dot_dimension_numbers<[1], [0], [0], [1], [0, 0, 1, 1], [], []>} : vector<32x12xbf16>, vector<12x128xbf16>, vector<32x128xf32> -> vector<32x128xf32>
    %c0_3 = arith.constant 0 : index
    %c0_4 = arith.constant 0 : index
    %4 = vector.load %arg3[%c0_3, %c0_4] : memref<32x1xf32, #tpu.memory_space<vmem>>, vector<32x1xf32>
    %5 = vector.broadcast %4 : vector<32x1xf32> to vector<32x128xf32>
    %6 = arith.addf %3, %5 : vector<32x128xf32>
    %cst_5 = arith.constant 0.000000e+00 : f32
    %7 = vector.broadcast %cst_5 : f32 to vector<32x128xf32>
    %8 = arith.maximumf %6, %7 : vector<32x128xf32>
    %c0_6 = arith.constant 0 : index
    %c0_7 = arith.constant 0 : index
    %9 = vector.load %arg4[%c0_6, %c0_7] : memref<32x1xf32, #tpu.memory_space<vmem>>, vector<32x1xf32>
    %10 = vector.broadcast %9 : vector<32x1xf32> to vector<32x128xf32>
    %11 = arith.mulf %8, %10 : vector<32x128xf32>
    %cst_8 = arith.constant dense<0.000000e+00> : vector<128xf32>
    %12 = vector.multi_reduction <add>, %11, %cst_8 [0] : vector<32x128xf32> to vector<128xf32>
    %13 = vector.shape_cast %12 : vector<128xf32> to vector<1x128xf32>
    %c0_9 = arith.constant 0 : index
    %c0_10 = arith.constant 0 : index
    %14 = memref.load %arg5[%c0_9, %c0_10] : memref<1x1xf32, #tpu.memory_space<smem>>
    %15 = vector.broadcast %14 : f32 to vector<1x128xf32>
    %16 = arith.addf %13, %15 : vector<1x128xf32>
    %c0_11 = arith.constant 0 : index
    %c0_12 = arith.constant 0 : index
    %17 = vector.load %arg6[%c0_11, %c0_12] : memref<1x128xf32, #tpu.memory_space<vmem>>, vector<1x128xf32>
    tpu.vector_store %arg6[%c0_11, %c0_12], %16 {strides = array<i32>} : memref<1x128xf32, #tpu.memory_space<vmem>>, vector<1x128xf32>,
    return
  }
  func.func @transform_0(%arg0: i32) -> (i32, i32) {
    %c0_i32 = arith.constant 0 : i32
    %c0_i32_0 = arith.constant 0 : i32
    return %c0_i32, %arg0 : i32, i32
  }
  func.func @transform_1(%arg0: i32) -> (i32, i32) {
    %c0_i32 = arith.constant 0 : i32
    %c0_i32_0 = arith.constant 0 : i32
    %c0_i32_1 = arith.constant 0 : i32
    return %c0_i32, %c0_i32_0 : i32, i32
  }
  func.func @transform_2(%arg0: i32) -> (i32, i32) {
    %c0_i32 = arith.constant 0 : i32
    %c0_i32_0 = arith.constant 0 : i32
    %c0_i32_1 = arith.constant 0 : i32
    return %c0_i32, %c0_i32_0 : i32, i32
  }
  func.func @transform_3(%arg0: i32) -> (i32, i32) {
    %c0_i32 = arith.constant 0 : i32
    %c0_i32_0 = arith.constant 0 : i32
    %c0_i32_1 = arith.constant 0 : i32
    return %c0_i32, %c0_i32_0 : i32, i32
  }
  func.func @transform_4(%arg0: i32) -> (i32, i32) {
    %c0_i32 = arith.constant 0 : i32
    %c0_i32_0 = arith.constant 0 : i32
    %c0_i32_1 = arith.constant 0 : i32
    return %c0_i32, %c0_i32_0 : i32, i32
  }
  func.func @transform_5(%arg0: i32) -> (i32, i32) {
    %c0_i32 = arith.constant 0 : i32
    %c0_i32_0 = arith.constant 0 : i32
    return %c0_i32, %arg0 : i32, i32
  }
}

</mosaic_0001>

<bundles_post_ra>
// kernel: tpu_custom_call.1
= control target key start
LH: loop header
LB: loop body
LE: loop exit
PB: predicated region body
PF: predicated region fallthrough
CT: control target
= control target key end

     0   :  { %vm71_vm0 = vcmask 1045504   ;;  %vm64_vm1 = vcmask 97280   ;;  %v225_v8 = vmov 0   ;;  %s299_s0 = inlined_call_operand.vmem [shape: f32[12,128], index: 0, kind: input, shape index: {}]   ;;  %s300_s1 = inlined_call_operand.vmem [shape: bf16[32,12], index: 1, kind: input, shape index: {}]   ;;  %s301_s2 = inlined_call_operand.vmem [shape: f32[32,1], index: 2, kind: input, shape index: {}]   ;;  %s302_s3 = inlined_call_operand.vmem [shape: f32[32,1], index: 3, kind: input, shape index: {}]   ;;  %s303_s4 = inlined_call_operand.<no memory space> [shape: f32[1,1], index: 4, kind: input, shape index: {}]   ;;  %s304_s5 = inlined_call_operand.hbm [shape: f32[1,128], index: 5, kind: output, shape index: {}]  }
   0x1   :  { %v23_v0 = vld [vmem:[%s299_s0] sm:$0xff]  ;;  %v24_v1 = vld [vmem:[%s299_s0 + $0x8] sm:$0xf]  ;;  %v32_v7 = vld [vmem:[%s301_s2 + $0x10] sm:$0xff]  ;;  %199 = vset.pattern.permute.xlu0 %v225_v8  ;;  %200 = vset.pattern.permute.xlu1 %v225_v8 }
   0x2   :  { %v25_v2 = vpack.c.bf16 %v24_v1, %v23_v0  ;;  %v201_v3 = vld [vmem:[%s300_s1] sm:$0xff]   ;;  %v202_v6 = vld [vmem:[%s300_s1 + $0x8] sm:$0xff]  }
   0x3   :  { %v30_v4 = vld [vmem:[%s301_s2] sm:$0xff]  ;;  %192 = vmatprep.mubr.msk.bf16.mxu0 %vm64_vm1, %v201_v3 }
   0x4   :  { %196 = vmatprep.subr.msk.bf16.mxu0 %vm71_vm0, %v25_v2  ;;  %v73_v5 = vsel %vm71_vm0, %v25_v2, 0  ;;  %36 = vperm.xlu0 %199, %v30_v4  }
   0x5   :  { %191 = vmatpush3.bf16.msra.mxu0 %v73_v5 }
   0x6   :  { %11 = vsyncpa [#allocation4], 0  ;;  %46 = vperm.xlu1 %200, %v32_v7   ;;  %v31_v9 = vld [vmem:[%s301_s2 + $0x8] sm:$0xff]  ;;  %v33_v10 = vld [vmem:[%s301_s2 + $0x18] sm:$0xff]  ;;  %v166_v47 = vstv %s303_s4  ;;  %s226_s15 = smov [#allocation3]  }
   0x7   :  { %v128_v11 = vld [vmem:[%s302_s3] sm:$0xff]  ;;  %v129_v12 = vld [vmem:[%s302_s3 + $0x8] sm:$0xff]  ;;  %v130_v13 = vld [vmem:[%s302_s3 + $0x10] sm:$0xff]  ;;  %s175_s16 = sshll.u32 %s226_s15, 4  ;;  %s176_s16 = int_to_ptr.vmem [resolvable:$true] %s175_s16 }
   0x8   :  { %193 = vmatmul.mubr.msk.bf16.vlgmr.msra.gmra.mxu0 %vm64_vm1, %v202_v6  ;;  %41 = vperm.xlu0 %199, %v31_v9   ;;  %v131_v14 = vld [vmem:[%s302_s3 + $0x18] sm:$0xff]  ;;  %s203_s17 = scalar_lea.vmem %s176_s16, 16  ;;  %s207_s18 = scalar_lea.vmem %s176_s16, 32 }
   0x9   :  { %p204_p0 = scmp.ne.s32.totalorder %s176_s16, %s203_s17  ;;  %p208_p1 = scmp.lt.s32.totalorder %s176_s16, %s176_s16 }
   0xa   :  { %51 = vperm.xlu1 %200, %v33_v10   ;;  %p209_p2 = scmp.lt.s32.totalorder %s207_s18, %s203_s17 }
   0xc   :  { %134 = vperm.xlu0 %199, %v128_v11   ;;  %p210_p3 = por %p209_p2, %p208_p1 }
   0xe   :  { %139 = vperm.xlu1 %200, %v129_v12   ;;  %p211_p4 = pnand %p210_p3, %p204_p0 }
  0x10   :  { %144 = vperm.xlu0 %199, %v130_v13  }
  0x12   :  { %149 = vperm.xlu1 %200, %v131_v14  }
  0x7f   :  { %v37_v15 = vpop.permute.xlu0 %36 }
  0x81   :  { %v47_v16 = vpop.permute.xlu1 %46 }
  0x83   :  { %v42_v17 = vpop.permute.xlu0 %41 }
  0x85   :  { %v52_v19 = vpop.permute.xlu1 %51 }
  0x87   :  { %v135_v24 = vpop.permute.xlu0 %134 }
  0x89   :  { %v140_v29 = vpop.permute.xlu1 %139 }
  0x8b   :  { %v145_v35 = vpop.permute.xlu0 %144 }
  0x8d   :  { %v150_v38 = vpop.permute.xlu1 %149 }
  0xc8   :  { %v194_v18 = vpop.f32.mrf.mxu0 }
  0xc9   :  { %v118_v23 = vadd.f32 %v194_v18, %v47_v16 }
  0xca   :  { %v109_v20 = vpop.f32.mrf.mxu0 }
  0xcb   :  { %v110_v21 = vadd.f32 %v109_v20, %v37_v15  ;;  %v126_v30 = vmax.f32 %v118_v23, 0.0 }
  0xcc   :  { %v195_v22 = vpop.f32.mrf.mxu0 }
  0xcd   :  { %v124_v26 = vmax.f32 %v110_v21, 0.0  ;;  %v121_v27 = vadd.f32 %v195_v22, %v52_v19  ;;  %v154_v36 = vmul.f32 %v145_v35, %v126_v30 }
  0xce   :  { %v112_v25 = vpop.f32.mrf.mxu0 }
  0xcf   :  { %v113_v28 = vadd.f32 %v112_v25, %v42_v17  ;;  %v152_v32 = vmul.f32 %v135_v24, %v124_v26  ;;  %v127_v33 = vmax.f32 %v121_v27, 0.0 }
  0xd1   :  { %v125_v31 = vmax.f32 %v113_v28, 0.0  ;;  %v155_v39 = vmul.f32 %v150_v38, %v127_v33 }
  0xd3   :  { %v153_v34 = vmul.f32 %v140_v29, %v125_v31 }
  0xd5   :  { %v156_v37 = vadd.f32 %v153_v34, %v152_v32 }
  0xd7   :  { %v157_v40 = vadd.f32 %v156_v37, %v154_v36 }
  0xd9   :  { %v158_v41 = vadd.f32 %v157_v40, %v155_v39 }
  0xdb   :  { %v159_v42 = vrot.slane %v158_v41, 4 }
  0xdd   :  { %v160_v43 = vadd.f32 %v159_v42, %v158_v41 }
  0xdf   :  { %v161_v44 = vrot.slane %v160_v43, 2 }
  0xe1   :  { %v162_v45 = vadd.f32 %v161_v44, %v160_v43 }
  0xe3   :  { %v163_v46 = vrot.slane %v162_v45, 1 }
  0xe5   :  { %v164_v48 = vadd.f32 %v163_v46, %v162_v45 }
  0xe7   :  { %v167_v49 = vadd.f32 %v166_v47, %v164_v48 }
  0xe9   :  { %168 = vst [vmem:[#allocation3] sm:$0x1] %v167_v49 }
  0xea   :  { %214 = shalt.err (!%p211_p4)
}
  0xeb   :  { %178 = dma.vmem_to_hbm [thread:$0]  %s176_s16, 16, %s304_s5, [#allocation4]  }
  0xec   :  { %223 = dma.done.wait [#allocation4], 16  }
  0xed   :  { %224 = vsyncadd [#allocation4], 4294967280 }
  0xee   :  { %182 = vsyncpa [#allocation4], 1 }

</bundles_post_ra>
